<compile_context>
chip_gen: v7x
topology: tpu7x:2x2x1
jax: 0.10.0
libtpu: 0.0.40
codegen_flags: <defaults>
</compile_context>

<pallas_src>
import jax
import jax.numpy as jnp
from jax.experimental import pallas as pl
from jax.experimental.pallas import tpu as pltpu

IN_FEATURES = 11
OUT_FEATURES = 3

# Batch-tile width (lanes).  (11+3 rows padded to 16+8 sublanes) * 512 * 4 B
# * 2 buffers ≈ 100 KiB of VMEM — tiny, safe on v5e/v6e (128 MiB) and v7x (64 MiB).
DEFAULT_TILE_B = 512


def _round_up(n: int, m: int) -> int:
    return ((n + m - 1) // m) * m


def _linear_kernel(w_ref, b_ref, x_ref, o_ref):
    """out[o, :] = sum_i w[o, i] * x[i, :] + b[o]   (33 broadcast FMAs on the VPU).

    w_ref: (3, 11) f32 in SMEM   (PyTorch (out, in) layout, no transpose needed)
    b_ref: (3,)    f32 in SMEM
    x_ref: (11, TB) f32 in VMEM  (feature-major, batch on lanes)
    o_ref: (3, TB)  f32 in VMEM
    """
    x = x_ref[...]  # (11, TB)
    rows = []
    for o in range(OUT_FEATURES):
        acc = x[0:1, :] * w_ref[o, 0]
        for i in range(1, IN_FEATURES):
            acc = acc + x[i:i + 1, :] * w_ref[o, i]
        rows.append(acc + b_ref[o])
    o_ref[...] = jnp.concatenate(rows, axis=0).astype(o_ref.dtype)


def soccer_agent_forward(x, weight, bias, *, tile_b: int = DEFAULT_TILE_B):
    """Forward pass of SoccerAgentModel: x @ weight.T + bias.

    x:      (batch, 11) float32
    weight: (3, 11)     float32   (PyTorch nn.Linear (out_features, in_features))
    bias:   (3,)        float32
    returns (batch, 3)  float32
    """
    batch = x.shape[0]

    # Tile width on the lane axis: multiple of 128, at most `tile_b`.
    tb = min(tile_b, _round_up(batch, 128))
    padded = _round_up(batch, tb)
    grid = (padded // tb,)

    # Feature-major layout: batch -> lanes (lane-dense loads/stores).
    xt = jnp.transpose(x)  # (11, batch)
    if padded != batch:
        xt = jnp.pad(xt, ((0, 0), (0, padded - batch)))

    out_t = pl.pallas_call(
        _linear_kernel,
        out_shape=jax.ShapeDtypeStruct((OUT_FEATURES, padded), x.dtype),
        grid=grid,
        in_specs=[
            # Tiny weight / bias live in SMEM; read as scalars in-kernel.
            pl.BlockSpec(memory_space=pltpu.MemorySpace.SMEM),
            pl.BlockSpec(memory_space=pltpu.MemorySpace.SMEM),
            # x: full feature dim (11) on sublanes, tb lanes of batch per step.
            pl.BlockSpec((IN_FEATURES, tb), lambda i: (0, i)),
        ],
        out_specs=pl.BlockSpec((OUT_FEATURES, tb), lambda i: (0, i)),
        compiler_params=pltpu.CompilerParams(
            dimension_semantics=("parallel",),
        ),
    )(weight, bias, xt)

    # Back to PyTorch convention (batch, 3), dropping the lane padding.
    return out_t[:, :batch].T


def init_params():
    # Matches SoccerAgentModel._init_weights: weight and bias zero-initialized.
    weight = jnp.zeros((OUT_FEATURES, IN_FEATURES), dtype=jnp.float32)  # (out, in)
    bias = jnp.zeros((OUT_FEATURES,), dtype=jnp.float32)
    return weight, bias


if __name__ == "__main__":
    key = jax.random.PRNGKey(0)
    kx, kw, kb = jax.random.split(key, 3)

    # Small shape consistent with the module: batch=8, in_features=11.
    batch = 8
    x = jax.random.normal(kx, (batch, IN_FEATURES), dtype=jnp.float32)

    # Zero-initialized params exactly as in the PyTorch module.
    weight, bias = init_params()
    out = jax.block_until_ready(soccer_agent_forward(x, weight, bias))
    ref = x @ weight.T + bias
    assert out.shape == (batch, OUT_FEATURES)
    assert jnp.allclose(out, ref, atol=1e-6), "mismatch vs reference (zero params)"

    # Extra numerics check with non-zero params and a batch that exercises the
    # multi-tile grid + lane-padding path (700 rows -> 2 tiles of 512 lanes).
    batch2 = 700
    x2 = jax.random.normal(kx, (batch2, IN_FEATURES), dtype=jnp.float32)
    w2 = jax.random.normal(kw, (OUT_FEATURES, IN_FEATURES), dtype=jnp.float32)
    b2 = jax.random.normal(kb, (OUT_FEATURES,), dtype=jnp.float32)
    out2 = jax.block_until_ready(soccer_agent_forward(x2, w2, b2))
    ref2 = x2 @ w2.T + b2
    assert out2.shape == (batch2, OUT_FEATURES)
    assert jnp.allclose(out2, ref2, atol=1e-5, rtol=1e-5), "mismatch vs reference (grid path)"

    print("KERNEL_OK")
</pallas_src>

<mosaic_0001>
module attributes {stable_mosaic.version = 11 : i64} {
  func.func @_linear_kernel(%arg0: i32, %arg1: memref<3x11xf32, #tpu.memory_space<smem>>, %arg2: memref<3xf32, #tpu.memory_space<smem>>, %arg3: memref<11x128xf32, #tpu.memory_space<vmem>>, %arg4: memref<3x128xf32, #tpu.memory_space<vmem>>) attributes {dimension_semantics = [#tpu.dimension_semantics<parallel>], iteration_bounds = array<i64: 1>, scalar_prefetch = 0 : i64, scratch_operands = 0 : i64, tpu.core_type = #tpu.core_type<tc>, window_params = [{transform_indices = @transform_0, window_bounds = array<i64: 3, 11>}, {transform_indices = @transform_1, window_bounds = array<i64: 3>}, {transform_indices = @transform_2, window_bounds = array<i64: 11, 128>}, {transform_indices = @transform_3, window_bounds = array<i64: 3, 128>}]} {
    %c0 = arith.constant 0 : index
    %c0_0 = arith.constant 0 : index
    %0 = vector.load %arg3[%c0, %c0_0] : memref<11x128xf32, #tpu.memory_space<vmem>>, vector<11x128xf32>
    %1 = vector.extract_strided_slice %0 {offsets = [0, 0], sizes = [1, 128], strides = [1, 1]} : vector<11x128xf32> to vector<1x128xf32>
    %c0_1 = arith.constant 0 : index
    %c0_2 = arith.constant 0 : index
    %2 = memref.load %arg1[%c0_1, %c0_2] : memref<3x11xf32, #tpu.memory_space<smem>>
    %3 = vector.broadcast %2 : f32 to vector<1x128xf32>
    %4 = arith.mulf %1, %3 : vector<1x128xf32>
    %5 = vector.extract_strided_slice %0 {offsets = [1, 0], sizes = [1, 128], strides = [1, 1]} : vector<11x128xf32> to vector<1x128xf32>
    %c0_3 = arith.constant 0 : index
    %c1 = arith.constant 1 : index
    %6 = memref.load %arg1[%c0_3, %c1] : memref<3x11xf32, #tpu.memory_space<smem>>
    %7 = vector.broadcast %6 : f32 to vector<1x128xf32>
    %8 = arith.mulf %5, %7 : vector<1x128xf32>
    %9 = arith.addf %4, %8 : vector<1x128xf32>
    %10 = vector.extract_strided_slice %0 {offsets = [2, 0], sizes = [1, 128], strides = [1, 1]} : vector<11x128xf32> to vector<1x128xf32>
    %c0_4 = arith.constant 0 : index
    %c2 = arith.constant 2 : index
    %11 = memref.load %arg1[%c0_4, %c2] : memref<3x11xf32, #tpu.memory_space<smem>>
    %12 = vector.broadcast %11 : f32 to vector<1x128xf32>
    %13 = arith.mulf %10, %12 : vector<1x128xf32>
    %14 = arith.addf %9, %13 : vector<1x128xf32>
    %15 = vector.extract_strided_slice %0 {offsets = [3, 0], sizes = [1, 128], strides = [1, 1]} : vector<11x128xf32> to vector<1x128xf32>
    %c0_5 = arith.constant 0 : index
    %c3 = arith.constant 3 : index
    %16 = memref.load %arg1[%c0_5, %c3] : memref<3x11xf32, #tpu.memory_space<smem>>
    %17 = vector.broadcast %16 : f32 to vector<1x128xf32>
    %18 = arith.mulf %15, %17 : vector<1x128xf32>
    %19 = arith.addf %14, %18 : vector<1x128xf32>
    %20 = vector.extract_strided_slice %0 {offsets = [4, 0], sizes = [1, 128], strides = [1, 1]} : vector<11x128xf32> to vector<1x128xf32>
    %c0_6 = arith.constant 0 : index
    %c4 = arith.constant 4 : index
    %21 = memref.load %arg1[%c0_6, %c4] : memref<3x11xf32, #tpu.memory_space<smem>>
    %22 = vector.broadcast %21 : f32 to vector<1x128xf32>
    %23 = arith.mulf %20, %22 : vector<1x128xf32>
    %24 = arith.addf %19, %23 : vector<1x128xf32>
    %25 = vector.extract_strided_slice %0 {offsets = [5, 0], sizes = [1, 128], strides = [1, 1]} : vector<11x128xf32> to vector<1x128xf32>
    %c0_7 = arith.constant 0 : index
    %c5 = arith.constant 5 : index
    %26 = memref.load %arg1[%c0_7, %c5] : memref<3x11xf32, #tpu.memory_space<smem>>
    %27 = vector.broadcast %26 : f32 to vector<1x128xf32>
    %28 = arith.mulf %25, %27 : vector<1x128xf32>
    %29 = arith.addf %24, %28 : vector<1x128xf32>
    %30 = vector.extract_strided_slice %0 {offsets = [6, 0], sizes = [1, 128], strides = [1, 1]} : vector<11x128xf32> to vector<1x128xf32>
    %c0_8 = arith.constant 0 : index
    %c6 = arith.constant 6 : index
    %31 = memref.load %arg1[%c0_8, %c6] : memref<3x11xf32, #tpu.memory_space<smem>>
    %32 = vector.broadcast %31 : f32 to vector<1x128xf32>
    %33 = arith.mulf %30, %32 : vector<1x128xf32>
    %34 = arith.addf %29, %33 : vector<1x128xf32>
    %35 = vector.extract_strided_slice %0 {offsets = [7, 0], sizes = [1, 128], strides = [1, 1]} : vector<11x128xf32> to vector<1x128xf32>
    %c0_9 = arith.constant 0 : index
    %c7 = arith.constant 7 : index
    %36 = memref.load %arg1[%c0_9, %c7] : memref<3x11xf32, #tpu.memory_space<smem>>
    %37 = vector.broadcast %36 : f32 to vector<1x128xf32>
    %38 = arith.mulf %35, %37 : vector<1x128xf32>
    %39 = arith.addf %34, %38 : vector<1x128xf32>
    %40 = vector.extract_strided_slice %0 {offsets = [8, 0], sizes = [1, 128], strides = [1, 1]} : vector<11x128xf32> to vector<1x128xf32>
    %c0_10 = arith.constant 0 : index
    %c8 = arith.constant 8 : index
    %41 = memref.load %arg1[%c0_10, %c8] : memref<3x11xf32, #tpu.memory_space<smem>>
    %42 = vector.broadcast %41 : f32 to vector<1x128xf32>
    %43 = arith.mulf %40, %42 : vector<1x128xf32>
    %44 = arith.addf %39, %43 : vector<1x128xf32>
    %45 = vector.extract_strided_slice %0 {offsets = [9, 0], sizes = [1, 128], strides = [1, 1]} : vector<11x128xf32> to vector<1x128xf32>
    %c0_11 = arith.constant 0 : index
    %c9 = arith.constant 9 : index
    %46 = memref.load %arg1[%c0_11, %c9] : memref<3x11xf32, #tpu.memory_space<smem>>
    %47 = vector.broadcast %46 : f32 to vector<1x128xf32>
    %48 = arith.mulf %45, %47 : vector<1x128xf32>
    %49 = arith.addf %44, %48 : vector<1x128xf32>
    %50 = vector.extract_strided_slice %0 {offsets = [10, 0], sizes = [1, 128], strides = [1, 1]} : vector<11x128xf32> to vector<1x128xf32>
    %c0_12 = arith.constant 0 : index
    %c10 = arith.constant 10 : index
    %51 = memref.load %arg1[%c0_12, %c10] : memref<3x11xf32, #tpu.memory_space<smem>>
    %52 = vector.broadcast %51 : f32 to vector<1x128xf32>
    %53 = arith.mulf %50, %52 : vector<1x128xf32>
    %54 = arith.addf %49, %53 : vector<1x128xf32>
    %c0_13 = arith.constant 0 : index
    %55 = memref.load %arg2[%c0_13] : memref<3xf32, #tpu.memory_space<smem>>
    %56 = vector.broadcast %55 : f32 to vector<1x128xf32>
    %57 = arith.addf %54, %56 : vector<1x128xf32>
    %58 = vector.extract_strided_slice %0 {offsets = [0, 0], sizes = [1, 128], strides = [1, 1]} : vector<11x128xf32> to vector<1x128xf32>
    %c1_14 = arith.constant 1 : index
    %c0_15 = arith.constant 0 : index
    %59 = memref.load %arg1[%c1_14, %c0_15] : memref<3x11xf32, #tpu.memory_space<smem>>
    %60 = vector.broadcast %59 : f32 to vector<1x128xf32>
    %61 = arith.mulf %58, %60 : vector<1x128xf32>
    %62 = vector.extract_strided_slice %0 {offsets = [1, 0], sizes = [1, 128], strides = [1, 1]} : vector<11x128xf32> to vector<1x128xf32>
    %c1_16 = arith.constant 1 : index
    %c1_17 = arith.constant 1 : index
    %63 = memref.load %arg1[%c1_16, %c1_17] : memref<3x11xf32, #tpu.memory_space<smem>>
    %64 = vector.broadcast %63 : f32 to vector<1x128xf32>
    %65 = arith.mulf %62, %64 : vector<1x128xf32>
    %66 = arith.addf %61, %65 : vector<1x128xf32>
    %67 = vector.extract_strided_slice %0 {offsets = [2, 0], sizes = [1, 128], strides = [1, 1]} : vector<11x128xf32> to vector<1x128xf32>
    %c1_18 = arith.constant 1 : index
    %c2_19 = arith.constant 2 : index
    %68 = memref.load %arg1[%c1_18, %c2_19] : memref<3x11xf32, #tpu.memory_space<smem>>
    %69 = vector.broadcast %68 : f32 to vector<1x128xf32>
    %70 = arith.mulf %67, %69 : vector<1x128xf32>
    %71 = arith.addf %66, %70 : vector<1x128xf32>
    %72 = vector.extract_strided_slice %0 {offsets = [3, 0], sizes = [1, 128], strides = [1, 1]} : vector<11x128xf32> to vector<1x128xf32>
    %c1_20 = arith.constant 1 : index
    %c3_21 = arith.constant 3 : index
    %73 = memref.load %arg1[%c1_20, %c3_21] : memref<3x11xf32, #tpu.memory_space<smem>>
    %74 = vector.broadcast %73 : f32 to vector<1x128xf32>
    %75 = arith.mulf %72, %74 : vector<1x128xf32>
    %76 = arith.addf %71, %75 : vector<1x128xf32>
    %77 = vector.extract_strided_slice %0 {offsets = [4, 0], sizes = [1, 128], strides = [1, 1]} : vector<11x128xf32> to vector<1x128xf32>
    %c1_22 = arith.constant 1 : index
    %c4_23 = arith.constant 4 : index
    %78 = memref.load %arg1[%c1_22, %c4_23] : memref<3x11xf32, #tpu.memory_space<smem>>
    %79 = vector.broadcast %78 : f32 to vector<1x128xf32>
    %80 = arith.mulf %77, %79 : vector<1x128xf32>
    %81 = arith.addf %76, %80 : vector<1x128xf32>
    %82 = vector.extract_strided_slice %0 {offsets = [5, 0], sizes = [1, 128], strides = [1, 1]} : vector<11x128xf32> to vector<1x128xf32>
    %c1_24 = arith.constant 1 : index
    %c5_25 = arith.constant 5 : index
    %83 = memref.load %arg1[%c1_24, %c5_25] : memref<3x11xf32, #tpu.memory_space<smem>>
    %84 = vector.broadcast %83 : f32 to vector<1x128xf32>
    %85 = arith.mulf %82, %84 : vector<1x128xf32>
    %86 = arith.addf %81, %85 : vector<1x128xf32>
    %87 = vector.extract_strided_slice %0 {offsets = [6, 0], sizes = [1, 128], strides = [1, 1]} : vector<11x128xf32> to vector<1x128xf32>
    %c1_26 = arith.constant 1 : index
    %c6_27 = arith.constant 6 : index
    %88 = memref.load %arg1[%c1_26, %c6_27] : memref<3x11xf32, #tpu.memory_space<smem>>
    %89 = vector.broadcast %88 : f32 to vector<1x128xf32>
    %90 = arith.mulf %87, %89 : vector<1x128xf32>
    %91 = arith.addf %86, %90 : vector<1x128xf32>
    %92 = vector.extract_strided_slice %0 {offsets = [7, 0], sizes = [1, 128], strides = [1, 1]} : vector<11x128xf32> to vector<1x128xf32>
    %c1_28 = arith.constant 1 : index
    %c7_29 = arith.constant 7 : index
    %93 = memref.load %arg1[%c1_28, %c7_29] : memref<3x11xf32, #tpu.memory_space<smem>>
    %94 = vector.broadcast %93 : f32 to vector<1x128xf32>
    %95 = arith.mulf %92, %94 : vector<1x128xf32>
    %96 = arith.addf %91, %95 : vector<1x128xf32>
    %97 = vector.extract_strided_slice %0 {offsets = [8, 0], sizes = [1, 128], strides = [1, 1]} : vector<11x128xf32> to vector<1x128xf32>
    %c1_30 = arith.constant 1 : index
    %c8_31 = arith.constant 8 : index
    %98 = memref.load %arg1[%c1_30, %c8_31] : memref<3x11xf32, #tpu.memory_space<smem>>
    %99 = vector.broadcast %98 : f32 to vector<1x128xf32>
    %100 = arith.mulf %97, %99 : vector<1x128xf32>
    %101 = arith.addf %96, %100 : vector<1x128xf32>
    %102 = vector.extract_strided_slice %0 {offsets = [9, 0], sizes = [1, 128], strides = [1, 1]} : vector<11x128xf32> to vector<1x128xf32>
    %c1_32 = arith.constant 1 : index
    %c9_33 = arith.constant 9 : index
    %103 = memref.load %arg1[%c1_32, %c9_33] : memref<3x11xf32, #tpu.memory_space<smem>>
    %104 = vector.broadcast %103 : f32 to vector<1x128xf32>
    %105 = arith.mulf %102, %104 : vector<1x128xf32>
    %106 = arith.addf %101, %105 : vector<1x128xf32>
    %107 = vector.extract_strided_slice %0 {offsets = [10, 0], sizes = [1, 128], strides = [1, 1]} : vector<11x128xf32> to vector<1x128xf32>
    %c1_34 = arith.constant 1 : index
    %c10_35 = arith.constant 10 : index
    %108 = memref.load %arg1[%c1_34, %c10_35] : memref<3x11xf32, #tpu.memory_space<smem>>
    %109 = vector.broadcast %108 : f32 to vector<1x128xf32>
    %110 = arith.mulf %107, %109 : vector<1x128xf32>
    %111 = arith.addf %106, %110 : vector<1x128xf32>
    %c1_36 = arith.constant 1 : index
    %112 = memref.load %arg2[%c1_36] : memref<3xf32, #tpu.memory_space<smem>>
    %113 = vector.broadcast %112 : f32 to vector<1x128xf32>
    %114 = arith.addf %111, %113 : vector<1x128xf32>
    %115 = vector.extract_strided_slice %0 {offsets = [0, 0], sizes = [1, 128], strides = [1, 1]} : vector<11x128xf32> to vector<1x128xf32>
    %c2_37 = arith.constant 2 : index
    %c0_38 = arith.constant 0 : index
    %116 = memref.load %arg1[%c2_37, %c0_38] : memref<3x11xf32, #tpu.memory_space<smem>>
    %117 = vector.broadcast %116 : f32 to vector<1x128xf32>
    %118 = arith.mulf %115, %117 : vector<1x128xf32>
    %119 = vector.extract_strided_slice %0 {offsets = [1, 0], sizes = [1, 128], strides = [1, 1]} : vector<11x128xf32> to vector<1x128xf32>
    %c2_39 = arith.constant 2 : index
    %c1_40 = arith.constant 1 : index
    %120 = memref.load %arg1[%c2_39, %c1_40] : memref<3x11xf32, #tpu.memory_space<smem>>
    %121 = vector.broadcast %120 : f32 to vector<1x128xf32>
    %122 = arith.mulf %119, %121 : vector<1x128xf32>
    %123 = arith.addf %118, %122 : vector<1x128xf32>
    %124 = vector.extract_strided_slice %0 {offsets = [2, 0], sizes = [1, 128], strides = [1, 1]} : vector<11x128xf32> to vector<1x128xf32>
    %c2_41 = arith.constant 2 : index
    %c2_42 = arith.constant 2 : index
    %125 = memref.load %arg1[%c2_41, %c2_42] : memref<3x11xf32, #tpu.memory_space<smem>>
    %126 = vector.broadcast %125 : f32 to vector<1x128xf32>
    %127 = arith.mulf %124, %126 : vector<1x128xf32>
    %128 = arith.addf %123, %127 : vector<1x128xf32>
    %129 = vector.extract_strided_slice %0 {offsets = [3, 0], sizes = [1, 128], strides = [1, 1]} : vector<11x128xf32> to vector<1x128xf32>
    %c2_43 = arith.constant 2 : index
    %c3_44 = arith.constant 3 : index
    %130 = memref.load %arg1[%c2_43, %c3_44] : memref<3x11xf32, #tpu.memory_space<smem>>
    %131 = vector.broadcast %130 : f32 to vector<1x128xf32>
    %132 = arith.mulf %129, %131 : vector<1x128xf32>
    %133 = arith.addf %128, %132 : vector<1x128xf32>
    %134 = vector.extract_strided_slice %0 {offsets = [4, 0], sizes = [1, 128], strides = [1, 1]} : vector<11x128xf32> to vector<1x128xf32>
    %c2_45 = arith.constant 2 : index
    %c4_46 = arith.constant 4 : index
    %135 = memref.load %arg1[%c2_45, %c4_46] : memref<3x11xf32, #tpu.memory_space<smem>>
    %136 = vector.broadcast %135 : f32 to vector<1x128xf32>
    %137 = arith.mulf %134, %136 : vector<1x128xf32>
    %138 = arith.addf %133, %137 : vector<1x128xf32>
    %139 = vector.extract_strided_slice %0 {offsets = [5, 0], sizes = [1, 128], strides = [1, 1]} : vector<11x128xf32> to vector<1x128xf32>
    %c2_47 = arith.constant 2 : index
    %c5_48 = arith.constant 5 : index
    %140 = memref.load %arg1[%c2_47, %c5_48] : memref<3x11xf32, #tpu.memory_space<smem>>
    %141 = vector.broadcast %140 : f32 to vector<1x128xf32>
    %142 = arith.mulf %139, %141 : vector<1x128xf32>
    %143 = arith.addf %138, %142 : vector<1x128xf32>
    %144 = vector.extract_strided_slice %0 {offsets = [6, 0], sizes = [1, 128], strides = [1, 1]} : vector<11x128xf32> to vector<1x128xf32>
    %c2_49 = arith.constant 2 : index
    %c6_50 = arith.constant 6 : index
    %145 = memref.load %arg1[%c2_49, %c6_50] : memref<3x11xf32, #tpu.memory_space<smem>>
    %146 = vector.broadcast %145 : f32 to vector<1x128xf32>
    %147 = arith.mulf %144, %146 : vector<1x128xf32>
    %148 = arith.addf %143, %147 : vector<1x128xf32>
    %149 = vector.extract_strided_slice %0 {offsets = [7, 0], sizes = [1, 128], strides = [1, 1]} : vector<11x128xf32> to vector<1x128xf32>
    %c2_51 = arith.constant 2 : index
    %c7_52 = arith.constant 7 : index
    %150 = memref.load %arg1[%c2_51, %c7_52] : memref<3x11xf32, #tpu.memory_space<smem>>
    %151 = vector.broadcast %150 : f32 to vector<1x128xf32>
    %152 = arith.mulf %149, %151 : vector<1x128xf32>
    %153 = arith.addf %148, %152 : vector<1x128xf32>
    %154 = vector.extract_strided_slice %0 {offsets = [8, 0], sizes = [1, 128], strides = [1, 1]} : vector<11x128xf32> to vector<1x128xf32>
    %c2_53 = arith.constant 2 : index
    %c8_54 = arith.constant 8 : index
    %155 = memref.load %arg1[%c2_53, %c8_54] : memref<3x11xf32, #tpu.memory_space<smem>>
    %156 = vector.broadcast %155 : f32 to vector<1x128xf32>
    %157 = arith.mulf %154, %156 : vector<1x128xf32>
    %158 = arith.addf %153, %157 : vector<1x128xf32>
    %159 = vector.extract_strided_slice %0 {offsets = [9, 0], sizes = [1, 128], strides = [1, 1]} : vector<11x128xf32> to vector<1x128xf32>
    %c2_55 = arith.constant 2 : index
    %c9_56 = arith.constant 9 : index
    %160 = memref.load %arg1[%c2_55, %c9_56] : memref<3x11xf32, #tpu.memory_space<smem>>
    %161 = vector.broadcast %160 : f32 to vector<1x128xf32>
    %162 = arith.mulf %159, %161 : vector<1x128xf32>
    %163 = arith.addf %158, %162 : vector<1x128xf32>
    %164 = vector.extract_strided_slice %0 {offsets = [10, 0], sizes = [1, 128], strides = [1, 1]} : vector<11x128xf32> to vector<1x128xf32>
    %c2_57 = arith.constant 2 : index
    %c10_58 = arith.constant 10 : index
    %165 = memref.load %arg1[%c2_57, %c10_58] : memref<3x11xf32, #tpu.memory_space<smem>>
    %166 = vector.broadcast %165 : f32 to vector<1x128xf32>
    %167 = arith.mulf %164, %166 : vector<1x128xf32>
    %168 = arith.addf %163, %167 : vector<1x128xf32>
    %c2_59 = arith.constant 2 : index
    %169 = memref.load %arg2[%c2_59] : memref<3xf32, #tpu.memory_space<smem>>
    %170 = vector.broadcast %169 : f32 to vector<1x128xf32>
    %171 = arith.addf %168, %170 : vector<1x128xf32>
    %172 = tpu.concatenate %57, %114, %171 in 0 : vector<1x128xf32>, vector<1x128xf32>, vector<1x128xf32> -> vector<3x128xf32>
    %c0_60 = arith.constant 0 : index
    %c0_61 = arith.constant 0 : index
    %173 = vector.load %arg4[%c0_60, %c0_61] : memref<3x128xf32, #tpu.memory_space<vmem>>, vector<3x128xf32>
    tpu.vector_store %arg4[%c0_60, %c0_61], %172 {strides = array<i32>} : memref<3x128xf32, #tpu.memory_space<vmem>>, vector<3x128xf32>,
    return
  }
  func.func @transform_0(%arg0: i32) -> (i32, i32) {
    %c0_i32 = arith.constant 0 : i32
    %c0_i32_0 = arith.constant 0 : i32
    %c0_i32_1 = arith.constant 0 : i32
    return %c0_i32, %c0_i32_0 : i32, i32
  }
  func.func @transform_1(%arg0: i32) -> i32 {
    %c0_i32 = arith.constant 0 : i32
    %c0_i32_0 = arith.constant 0 : i32
    return %c0_i32 : i32
  }
  func.func @transform_2(%arg0: i32) -> (i32, i32) {
    %c0_i32 = arith.constant 0 : i32
    %c0_i32_0 = arith.constant 0 : i32
    return %c0_i32, %arg0 : i32, i32
  }
  func.func @transform_3(%arg0: i32) -> (i32, i32) {
    %c0_i32 = arith.constant 0 : i32
    %c0_i32_0 = arith.constant 0 : i32
    return %c0_i32, %arg0 : i32, i32
  }
}

</mosaic_0001>

<bundles_post_ra>
// kernel: tpu_custom_call.1
= control target key start
LH: loop header
LB: loop body
LE: loop exit
PB: predicated region body
PF: predicated region fallthrough
CT: control target
= control target key end

     0   :  { %8 = vsyncpa [#allocation5], 0  ;;  %s601_s0 = inlined_call_operand.hbm [shape: f32[3,11], index: 0, kind: input, shape index: {}]   ;;  %s602_s1 = inlined_call_operand.vmem [shape: f32[3], index: 1, kind: input, shape index: {}]   ;;  %s603_s2 = inlined_call_operand.hbm [shape: f32[11,128], index: 2, kind: input, shape index: {}]   ;;  %s604_s3 = inlined_call_operand.hbm [shape: f32[3,128], index: 3, kind: output, shape index: {}]  }
   0x1   :  { %9 = vsyncpa [#allocation6], 0 }
   0x2   :  { %10 = vsyncpa [#allocation3], 0 }
   0x3   :  { %11 = vsyncpa [#allocation4], 0  ;;  %s26_s14 = sshll.u32 %s602_s1, 4  ;;  %s341_s17 = scalar_lea.hbm %s601_s0, 64  ;;  %s27_s14 = int_to_ptr.vmem [resolvable:$true] %s26_s14 }
   0x4   :  { %p342_p0 = scmp.ne.s32.totalorder %s601_s0, %s341_s17  ;;  %p345_p1 = scmp.lt.u32.totalorder %s341_s17, %s601_s0 }
   0x6   :  { %p347_p2 = pnand %p345_p1, %p342_p0 }
   0x8   :  { %350 = shalt.err (!%p347_p2)
}
   0x9   :  { %s415_s22 = smov [#allocation2]   ;;  %s351_s1 = scalar_lea.vmem %s27_s14, 16 }
   0xa   :  { %19 = dma.hbm_to_smem %s601_s0, 64, %s415_s22, [#allocation5]  }
   0xb   :  { %p352_p3 = scmp.ne.s32.totalorder %s27_s14, %s351_s1  ;;  %p356_p4 = scmp.lt.s32.totalorder %s27_s14, %s27_s14 }
   0xc   :  { %p357_p5 = scmp.lt.s32.totalorder %s351_s1, %s351_s1 }
   0xe   :  { %p358_p6 = por %p357_p5, %p356_p4 }
  0x10   :  { %p359_p7 = pnand %p358_p6, %p352_p3 }
  0x12   :  { %362 = shalt.err (!%p359_p7)
}
  0x13   :  { %s416_s25 = smov [#allocation7]   ;;  %s417_s26 = smov [#allocation8]  }
  0x14   :  { %29 = dma.vmem_to_smem %s27_s14, 16, %s416_s25, [#allocation6]  }
  0x15   :  { %s35_s27 = sshll.u32 %s417_s26, 4  ;;  %s363_s30 = scalar_lea.hbm %s603_s2, 256  ;;  %s36_s27 = int_to_ptr.vmem [resolvable:$true] %s35_s27 }
  0x16   :  { %p364_p8 = scmp.ne.s32.totalorder %s603_s2, %s363_s30  ;;  %p367_p9 = scmp.lt.u32.totalorder %s363_s30, %s603_s2 }
  0x18   :  { %p369_p10 = pnand %p367_p9, %p364_p8 }
  0x1a   :  { %372 = shalt.err (!%p369_p10)
}
  0x1b   :  { %s373_s7 = scalar_lea.vmem %s36_s27, 256  ;;  %p378_p12 = scmp.lt.s32.totalorder %s36_s27, %s36_s27 }
  0x1c   :  { %p374_p11 = scmp.ne.s32.totalorder %s36_s27, %s373_s7  ;;  %p379_p13 = scmp.lt.s32.totalorder %s373_s7, %s373_s7 }
  0x1e   :  { %p380_p0 = por %p379_p13, %p378_p12 }
  0x20   :  { %p381_p1 = pnand %p380_p0, %p374_p11 }
  0x22   :  { %384 = shalt.err (!%p381_p1)
}
  0x23   :  { %s418_s8 = smov 128   ;;  %s419_s9 = smov 8  }
  0x24   :  { %41 = dma.hbm_to_vmem [thread:$0]  %s603_s2, 256, %s36_s27, [#allocation3], %s418_s8, %s418_s8, %s419_s9  }
  0x25   :  { %407 = dma.done.wait [#allocation5], 64  }
  0x26   :  { %408 = vsyncadd [#allocation5], 4294967232 }
  0x27   :  { %409 = dma.done.wait [#allocation6], 16  }
  0x28   :  { %410 = vsyncadd [#allocation6], 4294967280 }
  0x29   :  { %411 = dma.done.wait [#allocation3], 256  }
  0x2a   :  { %412 = vsyncadd [#allocation3], 4294967040 }
  0x2b   :  { %51 = sfence }
  0x2c   :  { %s54_s12 = sld [smem:[#allocation2]]  ;;  %s301_s13 = sld [smem:[#allocation2 + $0x1]]  ;;  %v468_v0 = vld [vmem:[#allocation8] sm:$0xff]  ;;  %v530_v42 = vld [vmem:[#allocation8 + $0x8] sm:$0x7]  ;;  %vm279_vm0 = vcmask 1040384  }
  0x2d   :  { %s302_s14 = sld [smem:[#allocation2 + $0x2]]  ;;  %s303_s15 = sld [smem:[#allocation2 + $0x3]]  ;;  %vm281_vm1 = vcmask 1041408  }
  0x2e   :  { %s304_s16 = sld [smem:[#allocation2 + $0x4]]  ;;  %s305_s17 = sld [smem:[#allocation2 + $0x5]] }
  0x2f   :  { %s306_s18 = sld [smem:[#allocation2 + $0x6]]  ;;  %s470_s19 = sld [smem:[#allocation2 + $0x7]] }
  0x30   :  { %s472_s2 = sld [smem:[#allocation2 + $0x80]]  ;;  %s475_s20 = sld [smem:[#allocation2 + $0x81]] }
  0x31   :  { %s477_s21 = sld [smem:[#allocation2 + $0x82]]  ;;  %s481_s22 = sld [smem:[#allocation2 + $0x83]] }
  0x32   :  { %v55_v1 = vstv %s54_s12  ;;  %v58_v3 = vstv %s301_s13  ;;  %s484_s23 = sld [smem:[#allocation2 + $0x84]]  ;;  %s487_s24 = sld [smem:[#allocation2 + $0x85]] }
  0x33   :  { %v56_v2 = vmul.f32 %v55_v1, %v468_v0  ;;  %v65_v4 = vstv %s302_s14  ;;  %v59_v5 = vmul.f32 %v58_v3, %v468_v0  ;;  %v72_v7 = vstv %s303_s15  ;;  %s489_s1 = sld [smem:[#allocation2 + $0x86]]  ;;  %s491_s25 = sld [smem:[#allocation2 + $0x8]] }
  0x34   :  { %v66_v6 = vmul.f32 %v65_v4, %v468_v0  ;;  %v79_v8 = vstv %s304_s16  ;;  %v73_v9 = vmul.f32 %v72_v7, %v468_v0  ;;  %v86_v10 = vstv %s305_s17  ;;  %s495_s26 = sld [smem:[#allocation2 + $0x9]]  ;;  %s497_s27 = sld [smem:[#allocation2 + $0x87]] }
  0x35   :  { %v93_v11 = vstv %s306_s18  ;;  %v61_v12 = vrot.slane %v59_v5, 1  ;;  %v80_v14 = vmul.f32 %v79_v8, %v468_v0  ;;  %v87_v17 = vmul.f32 %v86_v10, %v468_v0  ;;  %s500_s28 = sld [smem:[#allocation2 + $0xa]]  ;;  %s506_s29 = sld [smem:[#allocation2 + $0x89]] }
  0x36   :  { %v68_v13 = vrot.slane %v66_v6, 2  ;;  %v75_v16 = vrot.slane %v73_v9, 3  ;;  %v94_v18 = vmul.f32 %v93_v11, %v468_v0  ;;  %v100_v21 = vstv %s470_s19  ;;  %s509_s30 = sld [smem:[#allocation2 + $0x88]]  ;;  %s517_s5 = sld [smem:[#allocation2 + $0x101]] }
  0x37   :  { %v63_v15 = vadd.f32 %v61_v12, %v56_v2  ;;  %v82_v20 = vrot.slane %v80_v14, 4  ;;  %v128_v22 = vstv %s472_s2  ;;  %v131_v23 = vstv %s475_s20  ;;  %s511_s4 = sld [smem:[#allocation2 + $0x100]]  ;;  %s522_s0 = sld [smem:[#allocation2 + $0x102]] }
  0x38   :  { %v138_v24 = vstv %s477_s21  ;;  %v145_v25 = vstv %s481_s22  ;;  %v89_v27 = vrot.slane %v87_v17, 5  ;;  %v96_v28 = vrot.slane %v94_v18, 6  ;;  %s526_s6 = sld [smem:[#allocation2 + $0x103]]  ;;  %s528_s7 = sld [smem:[#allocation2 + $0x104]] }
  0x39   :  { %v70_v19 = vadd.f32 %v68_v13, %v63_v15  ;;  %v129_v29 = vmul.f32 %v128_v22, %v468_v0  ;;  %v132_v30 = vmul.f32 %v131_v23, %v468_v0  ;;  %v139_v31 = vmul.f32 %v138_v24, %v468_v0  ;;  %s535_s8 = sld [smem:[#allocation2 + $0x8a]]  ;;  %s539_s9 = sld [smem:[#allocation2 + $0x105]] }
  0x3a   :  { %v146_v32 = vmul.f32 %v145_v25, %v468_v0  ;;  %v152_v33 = vstv %s484_s23  ;;  %v101_v35 = vmul.f32 %v100_v21, %v468_v0  ;;  %v159_v36 = vstv %s487_s24  ;;  %s541_s10 = sld [smem:[#allocation2 + $0x106]]  ;;  %s549_s11 = sld [smem:[#allocation2 + $0x107]] }
  0x3b   :  { %v77_v26 = vadd.f32 %v75_v16, %v70_v19  ;;  %v166_v37 = vstv %s489_s1  ;;  %v107_v38 = vstv %s491_s25  ;;  %v134_v39 = vrot.slane %v132_v30, 1  ;;  %s561_s12 = sld [smem:[#allocation2 + $0x109]]  ;;  %s568_s13 = sld [smem:[#allocation2 + $0x108]] }
  0x3c   :  { %v141_v40 = vrot.slane %v139_v31, 2  ;;  %v153_v41 = vmul.f32 %v152_v33, %v468_v0  ;;  %v111_v44 = vstv %s495_s26  ;;  %v160_v45 = vmul.f32 %v159_v36, %v468_v0  ;;  %s570_s14 = sld [smem:[#allocation2 + $0x10a]]  ;;  %s576_s15 = sld [smem:[#allocation7 + $0x1]] }
  0x3d   :  { %v84_v34 = vadd.f32 %v82_v20, %v77_v26  ;;  %v173_v46 = vstv %s497_s27  ;;  %v136_v47 = vadd.f32 %v134_v39, %v129_v29  ;;  %v148_v48 = vrot.slane %v146_v32, 3  ;;  %s124_s16 = sld [smem:[#allocation7]]  ;;  %s334_s17 = sld [smem:[#allocation7 + $0x2]] }
  0x3e   :  { %v167_v49 = vmul.f32 %v166_v37, %v468_v0  ;;  %v174_v50 = vmul.f32 %v173_v46, %v468_v0  ;;  %v103_v51 = vrot.slane %v101_v35, 7  ;;  %v108_v52 = vmul.f32 %v107_v38, %v530_v42  ;;  %s420_s18 = smov [#allocation9]  }
  0x3f   :  { %v91_v43 = vadd.f32 %v89_v27, %v84_v34  ;;  %v118_v53 = vstv %s500_s28  ;;  %v546_v54 = vmul.f32 %v111_v44, %v530_v42  ;;  %v143_v55 = vadd.f32 %v141_v40, %v136_v47  ;;  %s290_s19 = sshll.u32 %s420_s18, 4  ;;  %s291_s19 = int_to_ptr.vmem [resolvable:$true] %s290_s19 }
  0x40   :  { %v155_v56 = vrot.slane %v153_v41, 4  ;;  %v184_v57 = vstv %s506_s29  ;;  %v162_v59 = vrot.slane %v160_v45, 5  ;;  %v180_v60 = vstv %s509_s30  ;;  %s385_s2 = scalar_lea.vmem %s291_s19, 64  ;;  %p390_p3 = scmp.lt.s32.totalorder %s291_s19, %s291_s19 }
  0x41   :  { %v98_v58 = vadd.f32 %v96_v28, %v91_v43  ;;  %v201_v61 = vstv %s511_s4  ;;  %v150_v62 = vadd.f32 %v148_v48, %v143_v55  ;;  %v169_v63 = vrot.slane %v167_v49, 6  ;;  %p386_p2 = scmp.ne.s32.totalorder %s291_s19, %s385_s2  ;;  %p391_p4 = scmp.lt.s32.totalorder %s385_s2, %s385_s2 }
  0x42   :  { %v176_v1 = vrot.slane %v174_v50, 7  ;;  %v204_v2 = vstv %s517_s5  ;;  %v185_v3 = vmul.f32 %v184_v57, %v530_v42  ;;  %v202_v4 = vmul.f32 %v201_v61, %v468_v0 }
  0x43   :  { %v205_v5 = vmul.f32 %v204_v2, %v468_v0  ;;  %v211_v6 = vstv %s522_s0  ;;  %v157_v7 = vadd.f32 %v155_v56, %v150_v62  ;;  %v218_v9 = vstv %s526_s6  ;;  %p392_p5 = por %p391_p4, %p390_p3 }
  0x44   :  { %v212_v8 = vmul.f32 %v211_v6, %v468_v0  ;;  %v225_v10 = vstv %s528_s7  ;;  %v191_v11 = vstv %s535_s8  ;;  %v219_v13 = vmul.f32 %v218_v9, %v468_v0 }
  0x45   :  { %v207_v12 = vrot.slane %v205_v5, 1  ;;  %v226_v14 = vmul.f32 %v225_v10, %v468_v0  ;;  %v164_v15 = vadd.f32 %v162_v59, %v157_v7  ;;  %v232_v17 = vstv %s539_s9  ;;  %p393_p6 = pnand %p392_p5, %p386_p2 }
  0x46   :  { %v214_v16 = vrot.slane %v212_v8, 2  ;;  %v239_v18 = vstv %s541_s10  ;;  %v105_v19 = vadd.f32 %v103_v51, %v98_v58  ;;  %v181_v20 = vmul.f32 %v180_v60, %v530_v42 }
  0x47   :  { %v209_v21 = vadd.f32 %v207_v12, %v202_v4  ;;  %v221_v22 = vrot.slane %v219_v13, 3  ;;  %v171_v23 = vadd.f32 %v169_v63, %v164_v15  ;;  %v192_v24 = vmul.f32 %v191_v11, %v530_v42 }
  0x48   :  { %v233_v25 = vmul.f32 %v232_v17, %v468_v0  ;;  %v246_v26 = vstv %s549_s11  ;;  %v228_v28 = vrot.slane %v226_v14, 4  ;;  %v240_v29 = vmul.f32 %v239_v18, %v468_v0 }
  0x49   :  { %v216_v27 = vadd.f32 %v214_v16, %v209_v21  ;;  %v119_v30 = vmul.f32 %v118_v53, %v530_v42  ;;  %v178_v31 = vadd.f32 %v176_v1, %v171_v23  ;;  %v187_v32 = vrot.slane %v185_v3, 1 }
  0x4a   :  { %v114_v33 = vrot.slane %v546_v54, 1  ;;  %v235_v35 = vrot.slane %v233_v25, 5  ;;  %v247_v36 = vmul.f32 %v246_v26, %v468_v0  ;;  %v109_v37 = vadd.f32 %v108_v52, %v105_v19 }
  0x4b   :  { %v223_v34 = vadd.f32 %v221_v22, %v216_v27  ;;  %v182_v38 = vadd.f32 %v181_v20, %v178_v31  ;;  %v194_v39 = vrot.slane %v192_v24, 2  ;;  %v257_v40 = vstv %s561_s12 }
  0x4c   :  { %v242_v43 = vrot.slane %v240_v29, 6  ;;  %v253_v45 = vstv %s568_s13  ;;  %v264_v46 = vstv %s570_s14  ;;  %v249_v48 = vrot.slane %v247_v36, 7 }
  0x4d   :  { %v230_v41 = vadd.f32 %v228_v28, %v223_v34  ;;  %v189_v44 = vadd.f32 %v187_v32, %v182_v38  ;;  %v258_v49 = vmul.f32 %v257_v40, %v530_v42  ;;  %v116_v50 = vadd.f32 %v114_v33, %v109_v37 }
  0x4e   :  { %v121_v51 = vrot.slane %v119_v30, 2  ;;  %v198_v0 = vstv %s576_s15  ;;  %v254_v54 = vmul.f32 %v253_v45, %v530_v42  ;;  %v265_v55 = vmul.f32 %v264_v46, %v530_v42 }
  0x4f   :  { %v237_v47 = vadd.f32 %v235_v35, %v230_v41  ;;  %v196_v53 = vadd.f32 %v194_v39, %v189_v44  ;;  %v260_v57 = vrot.slane %v258_v49, 1  ;;  %v125_v60 = vstv %s124_s16 }
  0x50   :  { %v123_v58 = vadd.f32 %v121_v51, %v116_v50  ;;  %v267_v62 = vrot.slane %v265_v55, 2  ;;  %v271_v2 = vstv %s334_s17 }
  0x51   :  { %v244_v52 = vadd.f32 %v242_v43, %v237_v47  ;;  %v199_v59 = vadd.f32 %v198_v0, %v196_v53 }
  0x52   :  { %v126_v1 = vadd.f32 %v125_v60, %v123_v58 }
  0x53   :  { %v251_v56 = vadd.f32 %v249_v48, %v244_v52  ;;  %v274_v3 = vrot.slane %v199_v59, 7 }
  0x55   :  { %v255_v61 = vadd.f32 %v254_v54, %v251_v56  ;;  %v280_v6 = vsel %vm279_vm0, %v126_v1, %v274_v3 }
  0x57   :  { %v262_v63 = vadd.f32 %v260_v57, %v255_v61 }
  0x59   :  { %v269_v4 = vadd.f32 %v267_v62, %v262_v63 }
  0x5b   :  { %v272_v5 = vadd.f32 %v271_v2, %v269_v4 }
  0x5d   :  { %v277_v7 = vrot.slane %v272_v5, 6 }
  0x5f   :  { %v282_v42 = vsel %vm281_vm1, %v280_v6, %v277_v7 }
  0x60   :  { %283 = vst [vmem:[#allocation9] sm:$0x7] %v282_v42 }
  0x61   :  { %396 = shalt.err (!%p393_p6)
}
  0x62   :  { %s397_s22 = scalar_lea.hbm %s604_s3, 64 }
  0x63   :  { %p398_p7 = scmp.ne.s32.totalorder %s604_s3, %s397_s22  ;;  %p401_p8 = scmp.lt.u32.totalorder %s397_s22, %s604_s3 }
  0x65   :  { %p403_p9 = pnand %p401_p8, %p398_p7 }
  0x67   :  { %406 = shalt.err (!%p403_p9)
}
  0x68   :  { %293 = dma.vmem_to_hbm [thread:$0]  %s291_s19, 64, %s604_s3, [#allocation4]  }
  0x69   :  { %413 = dma.done.wait [#allocation4], 64  }
  0x6a   :  { %414 = vsyncadd [#allocation4], 4294967232 }
  0x6b   :  { %297 = vsyncpa [#allocation3], 1 }
  0x6c   :  { %298 = vsyncpa [#allocation4], 1 }
  0x6d   :  { %299 = vsyncpa [#allocation5], 1 }
  0x6e   :  { %300 = vsyncpa [#allocation6], 1 }

</bundles_post_ra>
